<compile_context>
chip_gen: v7x
topology: tpu7x:2x2x1
jax: 0.10.0
libtpu: 0.0.40
codegen_flags: <defaults>
</compile_context>

<pallas_src>
import functools

import jax
import jax.numpy as jnp
from jax.experimental import pallas as pl
from jax.experimental.pallas import tpu as pltpu


# ----------------------------- helpers ------------------------------

def _pick_tile(m):
    """Largest multiple-of-8 tile dividing m that still yields >=2 grid steps."""
    for t in (512, 256, 128, 64, 32, 16, 8):
        if m % t == 0 and t <= m // 2:
            return t
    return m


def _fold_sep(dw_w, bn_dw, pw_w, bn_out):
    """Fold depthwise taps + dw-BN + 1x1 pointwise + out-BN into MXU weights.

    dw_w: (9, cin) packed taps; bn_*: (scale, bias); pw_w: (cin, cout).
    Returns (wt (9,cin,cout) bf16, scale (cout,), bias (cout,)) such that
      BN_out(PW(BN_dw(DW(x)))) == (sum_t x_shift_t @ wt[t]) * scale + bias.
    """
    s_dw, b_dw = bn_dw
    s_o, b_o = bn_out
    wt = (dw_w * s_dw[None, :])[:, :, None] * pw_w[None, :, :]   # (9, cin, cout)
    bias = s_o * (b_dw @ pw_w) + b_o
    return wt.astype(jnp.bfloat16), s_o, bias


# ----------------------------- Pallas kernels ------------------------------

def _fill_pad(pad_ref, x, hw, w):
    """Write x into the center of the flat halo scratch, zero the halos."""
    c = x.shape[1]
    zeros = jnp.zeros((w + 1, c), jnp.float32)
    pad_ref[0:w + 1, :] = zeros
    pad_ref[w + 1 + hw:hw + 2 * w + 2, :] = zeros
    pad_ref[w + 1:w + 1 + hw, :] = x


def _sep_stage(pad_ref, wt_ref, s_ref, b_ref, hw, w, mask_l, mask_r, relu):
    """One SeparableConv2d (+BN [+ReLU]) as 9 shifted MXU matmuls."""
    cout = wt_ref.shape[2]
    acc = jnp.zeros((hw, cout), jnp.float32)
    for oh in (-1, 0, 1):
        for ow in (-1, 0, 1):
            t = (oh + 1) * 3 + (ow + 1)
            s0 = w + 1 + oh * w + ow
            slab = pad_ref[s0:s0 + hw, :]
            if ow == -1:
                slab = slab * mask_l
            elif ow == 1:
                slab = slab * mask_r
            acc = acc + jnp.dot(slab.astype(jnp.bfloat16), wt_ref[t],
                                preferred_element_type=jnp.float32)
    y = acc * s_ref[...] + b_ref[...]
    if relu:
        y = jnp.maximum(y, 0.0)
    return y


def _block_kernel(x_ref, wt1_ref, s1_ref, b1_ref, wt2_ref, s2_ref, b2_ref,
                  wt3_ref, s3_ref, b3_ref, o_ref, pad_a, pad_b,
                  *, w, start_with_relu, add_identity):
    """Fused residual Block: sep1 -> sep2 -> sep3 [+ identity residual]."""
    hw = x_ref.shape[1]
    col = jax.lax.broadcasted_iota(jnp.int32, (hw, 1), 0) % w
    mask_l = (col > 0).astype(jnp.float32)          # taps reading column j-1
    mask_r = (col < (w - 1)).astype(jnp.float32)    # taps reading column j+1

    x = x_ref[0]                                    # (hw, cin) f32
    xin = jnp.maximum(x, 0.0) if start_with_relu else x
    _fill_pad(pad_a, xin, hw, w)
    h1 = _sep_stage(pad_a, wt1_ref, s1_ref, b1_ref, hw, w, mask_l, mask_r, True)
    _fill_pad(pad_b, h1, hw, w)
    h2 = _sep_stage(pad_b, wt2_ref, s2_ref, b2_ref, hw, w, mask_l, mask_r, True)
    _fill_pad(pad_b, h2, hw, w)
    y = _sep_stage(pad_b, wt3_ref, s3_ref, b3_ref, hw, w, mask_l, mask_r, False)
    if add_identity:
        y = y + x                                   # residual uses original input
    o_ref[0] = y


def _pw_kernel(*refs, relu, has_preadd, has_res):
    # y = [relu]( ((a [+ a2]) @ W) * s + b [+ residual] ), f32 accumulation.
    i = 0
    a_ref = refs[i]; i += 1
    a2_ref = None
    if has_preadd:
        a2_ref = refs[i]; i += 1
    w_ref, s_ref, b_ref = refs[i], refs[i + 1], refs[i + 2]; i += 3
    r_ref = None
    if has_res:
        r_ref = refs[i]; i += 1
    o_ref = refs[i]
    a = a_ref[...]
    if has_preadd:
        a = a + a2_ref[...]
    y = jnp.dot(a.astype(jnp.bfloat16), w_ref[...],
                preferred_element_type=jnp.float32)
    y = y * s_ref[...] + b_ref[...]
    if has_res:
        y = y + r_ref[...]
    if relu:
        y = jnp.maximum(y, 0.0)
    o_ref[...] = y


# ----------------------------- kernel wrappers ------------------------------

@functools.partial(jax.jit, static_argnames=("start_with_relu", "add_identity"))
def block_fused(x, f1, f2, f3, *, start_with_relu, add_identity):
    """One fused residual block.  f_i = (wt (9,ci,co) bf16, scale, bias)."""
    n, h, w, cin = x.shape
    hw = h * w
    wt1, s1, b1 = f1
    wt2, s2, b2 = f2
    wt3, s3, b3 = f3
    c4 = wt1.shape[2]
    cout = wt3.shape[2]
    assert (not add_identity) or cin == cout

    out = pl.pallas_call(
        functools.partial(_block_kernel, w=w, start_with_relu=start_with_relu,
                          add_identity=add_identity),
        out_shape=jax.ShapeDtypeStruct((n, hw, cout), jnp.float32),
        grid=(n,),
        in_specs=[
            pl.BlockSpec((1, hw, cin), lambda i: (i, 0, 0)),
            pl.BlockSpec((9, cin, c4), lambda i: (0, 0, 0)),
            pl.BlockSpec((1, c4), lambda i: (0, 0)),
            pl.BlockSpec((1, c4), lambda i: (0, 0)),
            pl.BlockSpec((9, c4, c4), lambda i: (0, 0, 0)),
            pl.BlockSpec((1, c4), lambda i: (0, 0)),
            pl.BlockSpec((1, c4), lambda i: (0, 0)),
            pl.BlockSpec((9, c4, cout), lambda i: (0, 0, 0)),
            pl.BlockSpec((1, cout), lambda i: (0, 0)),
            pl.BlockSpec((1, cout), lambda i: (0, 0)),
        ],
        out_specs=pl.BlockSpec((1, hw, cout), lambda i: (i, 0, 0)),
        scratch_shapes=[pltpu.VMEM((hw + 2 * w + 2, cin), jnp.float32),
                        pltpu.VMEM((hw + 2 * w + 2, c4), jnp.float32)],
        compiler_params=pltpu.CompilerParams(dimension_semantics=("parallel",)),
    )(x.reshape(n, hw, cin),
      wt1, s1.reshape(1, c4), b1.reshape(1, c4),
      wt2, s2.reshape(1, c4), b2.reshape(1, c4),
      wt3, s3.reshape(1, cout), b3.reshape(1, cout))
    return out.reshape(n, h, w, cout)


@functools.partial(jax.jit, static_argnames=("relu",))
def pointwise(a, w, scale, bias, *, relu, preadd=None, residual=None):
    """Tiled 1x1-conv matmul: [relu](((a [+ preadd]) @ W) * scale + bias [+ residual])."""
    m, k = a.shape
    nout = w.shape[1]
    tm = _pick_tile(m)
    args = [a]
    specs = [pl.BlockSpec((tm, k), lambda i: (i, 0))]
    if preadd is not None:
        args.append(preadd)
        specs.append(pl.BlockSpec((tm, k), lambda i: (i, 0)))
    args += [w.astype(jnp.bfloat16), scale.reshape(1, nout), bias.reshape(1, nout)]
    specs += [pl.BlockSpec((k, nout), lambda i: (0, 0)),
              pl.BlockSpec((1, nout), lambda i: (0, 0)),
              pl.BlockSpec((1, nout), lambda i: (0, 0))]
    if residual is not None:
        args.append(residual)
        specs.append(pl.BlockSpec((tm, nout), lambda i: (i, 0)))
    return pl.pallas_call(
        functools.partial(_pw_kernel, relu=relu,
                          has_preadd=preadd is not None,
                          has_res=residual is not None),
        out_shape=jax.ShapeDtypeStruct((m, nout), jnp.float32),
        grid=(m // tm,),
        in_specs=specs,
        out_specs=pl.BlockSpec((tm, nout), lambda i: (i, 0)),
        compiler_params=pltpu.CompilerParams(dimension_semantics=("parallel",)),
    )(*args)


# ----------------------------- JAX glue layers ------------------------------

def pw4d(x, w, bn, relu):
    n, h, ww, c = x.shape
    return pointwise(x.reshape(-1, c), w, bn[0], bn[1], relu=relu).reshape(n, h, ww, -1)


def merge_add(a, b, w, bn):
    # merge_conv(a + b): the elementwise add happens on the VPU inside the
    # matmul kernel (single MXU pass).
    n, h, ww, c = a.shape
    y = pointwise(a.reshape(-1, c), w, bn[0], bn[1], relu=True,
                  preadd=b.reshape(-1, c))
    return y.reshape(n, h, ww, -1)


def _lin_coords(out_size, in_size):
    i = jnp.arange(out_size, dtype=jnp.float32)
    src = (i + 0.5) * (in_size / out_size) - 0.5
    src = jnp.clip(src, 0.0, float(in_size - 1))
    i0 = jnp.floor(src).astype(jnp.int32)
    i1 = jnp.minimum(i0 + 1, in_size - 1)
    w = src - i0.astype(jnp.float32)
    return i0, i1, w


def upsample_bilinear(x, oh, ow):
    # TODO(synk): bilinear resize (F.upsample, align_corners=False convention)
    # is done with JAX gathers (glue), not inside a Pallas kernel.
    n, h, w, c = x.shape
    h0, h1, wh = _lin_coords(oh, h)
    w0, w1, ww = _lin_coords(ow, w)
    top, bot = x[:, h0], x[:, h1]
    xh = top * (1.0 - wh)[None, :, None, None] + bot * wh[None, :, None, None]
    left, right = xh[:, :, w0], xh[:, :, w1]
    return left * (1.0 - ww)[None, None, :, None] + right * ww[None, None, :, None]


def conv1_forward(x, w, bn):
    # TODO(synk): 3x3 stride-2 stem conv uses an XLA im2col; the matmul+BN+ReLU
    # run in the Pallas pointwise kernel.
    xp = jnp.pad(x, ((0, 0), (1, 1), (1, 1), (0, 0)))
    n, hp, wp, c = xp.shape
    ho = (hp - 3) // 2 + 1
    wo = (wp - 3) // 2 + 1
    cols = [xp[:, dh:dh + 2 * ho - 1:2, dw:dw + 2 * wo - 1:2, :]
            for dh in range(3) for dw in range(3)]
    patches = jnp.concatenate(cols, axis=-1)                 # (N, Ho, Wo, 9*C)
    y = pointwise(patches.reshape(-1, 9 * c), w, bn[0], bn[1], relu=True)
    return y.reshape(n, ho, wo, -1)


def block_forward(x, bp, stride, start_with_relu):
    f1 = _fold_sep(bp["sep1"]["dw"], bp["sep1"]["bn_dw"], bp["sep1"]["pw"], bp["bn1"])
    f2 = _fold_sep(bp["sep2"]["dw"], bp["sep2"]["bn_dw"], bp["sep2"]["pw"], bp["bn2"])
    f3 = _fold_sep(bp["sep3"]["dw"], bp["sep3"]["bn_dw"], bp["sep3"]["pw"], bp["bn3"])

    if stride == 1 and "skip_w" not in bp:
        # Whole block (3 sep-convs + identity residual) in one pallas_call.
        return block_fused(x, f1, f2, f3, start_with_relu=start_with_relu,
                           add_identity=True)

    # Entry (stride-2) block: fused sep1->sep2->sep3 at full resolution, then
    # 2x2 subsample + fused 1x1 skip conv + skip BN + residual add.
    y_full = block_fused(x, f1, f2, f3, start_with_relu=start_with_relu,
                         add_identity=False)
    # TODO(synk): the 2x2 subsample is an XLA strided slice (small copy);
    # moving it in-kernel would need strided sublane reads / H-row gridding.
    if stride == 2:
        y_sub = y_full[:, ::2, ::2, :]
        xs = x[:, ::2, ::2, :]
    else:
        y_sub, xs = y_full, x
    n, ho, wo, cout = y_sub.shape
    cin = xs.shape[-1]
    out = pointwise(xs.reshape(-1, cin), bp["skip_w"],
                    bp["skip_bn"][0], bp["skip_bn"][1],
                    relu=False, residual=y_sub.reshape(-1, cout))
    return out.reshape(n, ho, wo, cout)


def enc_forward(x, blocks):
    h = block_forward(x, blocks[0], stride=2, start_with_relu=False)
    for bp in blocks[1:]:
        h = block_forward(h, bp, stride=1, start_with_relu=True)
    return h


# ----------------------------- parameters ------------------------------

class ParamGen:
    def __init__(self, key):
        self._key = key

    def _next(self):
        self._key, sub = jax.random.split(self._key)
        return sub

    def conv(self, shape, fan_in):
        std = (2.0 / fan_in) ** 0.5
        return std * jax.random.normal(self._next(), shape, jnp.float32)

    def bn(self, c):
        # inference-mode BatchNorm folded to per-channel (scale, bias)
        gamma = 1.0 + 0.1 * jax.random.normal(self._next(), (c,), jnp.float32)
        beta = 0.1 * jax.random.normal(self._next(), (c,), jnp.float32)
        mean = 0.1 * jax.random.normal(self._next(), (c,), jnp.float32)
        var = jnp.abs(1.0 + 0.1 * jax.random.normal(self._next(), (c,), jnp.float32))
        scale = gamma / jnp.sqrt(var + 1e-5)
        bias = beta - mean * scale
        return scale, bias


def sep_params(pg, cin, cout):
    return dict(dw=pg.conv((9, cin), 9),          # packed (kh*kw, C) depthwise taps
                bn_dw=pg.bn(cin),
                pw=pg.conv((cin, cout), cin))     # pointwise weight (Cin, Cout)


def block_params(pg, cin, cout, stride):
    p4 = cout // 4
    p = dict(sep1=sep_params(pg, cin, p4), bn1=pg.bn(p4),
             sep2=sep_params(pg, p4, p4), bn2=pg.bn(p4),
             sep3=sep_params(pg, p4, cout), bn3=pg.bn(cout))
    if cout != cin or stride != 1:
        p["skip_w"] = pg.conv((cin, cout), cin)
        p["skip_bn"] = pg.bn(cout)
    return p


def enc_params(pg, cin, cout, stage):
    rep_nums = 4 if stage in (2, 4) else 6
    blocks = [block_params(pg, cin, cout, 2)]
    for _ in range(rep_nums - 1):
        blocks.append(block_params(pg, cout, cout, 1))
    return blocks


def make_params(key):
    pg = ParamGen(key)
    P = {}
    P["conv1_w"] = pg.conv((27, 8), 27)           # (kh*kw*Cin, Cout)
    P["conv1_bn"] = pg.bn(8)
    P["enc2a"] = enc_params(pg, 8, 48, 2)
    P["enc2b"] = enc_params(pg, 240, 48, 2)
    P["enc2c"] = enc_params(pg, 240, 48, 2)
    P["enc3a"] = enc_params(pg, 48, 96, 3)
    P["enc3b"] = enc_params(pg, 144, 96, 3)
    P["enc3c"] = enc_params(pg, 144, 96, 3)
    P["enc4a"] = enc_params(pg, 96, 192, 4)
    P["enc4b"] = enc_params(pg, 288, 192, 4)
    P["enc4c"] = enc_params(pg, 288, 192, 4)
    P["fca1_w"], P["fca1_bn"] = pg.conv((192, 32), 192), pg.bn(32)
    P["fca2_w"], P["fca2_bn"] = pg.conv((192, 32), 192), pg.bn(32)
    P["fca3_w"], P["fca3_bn"] = pg.conv((192, 32), 192), pg.bn(32)
    P["merge_w"], P["merge_bn"] = pg.conv((32, 32), 32), pg.bn(32)   # shared 3x
    P["last_w"] = pg.conv((32, 1), 32)
    return P


# ----------------------------- full forward ------------------------------

def xception_forward(x_nchw, P):
    x = jnp.transpose(x_nchw, (0, 2, 3, 1)).astype(jnp.float32)      # NCHW -> NHWC

    stage1 = conv1_forward(x, P["conv1_w"], P["conv1_bn"])
    e2a = enc_forward(stage1, P["enc2a"])
    e3a = enc_forward(e2a, P["enc3a"])
    e4a = enc_forward(e3a, P["enc4a"])

    up1 = upsample_bilinear(e4a, e2a.shape[1], e2a.shape[2])
    e2b = enc_forward(jnp.concatenate([up1, e2a], axis=-1), P["enc2b"])
    e3b = enc_forward(jnp.concatenate([e2b, e3a], axis=-1), P["enc3b"])
    e4b = enc_forward(jnp.concatenate([e3b, e4a], axis=-1), P["enc4b"])

    up2 = upsample_bilinear(e4b, e2b.shape[1], e2b.shape[2])
    e2c = enc_forward(jnp.concatenate([up2, e2b], axis=-1), P["enc2c"])
    e3c = enc_forward(jnp.concatenate([e2c, e3b], axis=-1), P["enc3c"])
    e4c = enc_forward(jnp.concatenate([e3c, e4b], axis=-1), P["enc4c"])

    fca1 = pw4d(e4a, P["fca1_w"], P["fca1_bn"], True)
    fca2 = pw4d(e4b, P["fca2_w"], P["fca2_bn"], True)
    fca3 = pw4d(e4c, P["fca3_w"], P["fca3_bn"], True)

    fca3_up = upsample_bilinear(fca3, fca2.shape[1], fca2.shape[2])
    m1 = merge_add(fca2, fca3_up, P["merge_w"], P["merge_bn"])
    m1_up = upsample_bilinear(m1, fca1.shape[1], fca1.shape[2])
    m2 = merge_add(fca1, m1_up, P["merge_w"], P["merge_bn"])
    m2_up = upsample_bilinear(m2, e3a.shape[1], e3a.shape[2])
    m3 = pw4d(m2_up, P["merge_w"], P["merge_bn"], True)

    n, h, wd, c = m3.shape
    # TODO(synk): the final 1-channel output is lane-sparse; negligible at this size.
    out = pointwise(m3.reshape(-1, c), P["last_w"],
                    jnp.ones((1,), jnp.float32), jnp.zeros((1,), jnp.float32),
                    relu=False).reshape(n, h, wd, 1)
    return jnp.transpose(out, (0, 3, 1, 2))                           # NHWC -> NCHW


if __name__ == "__main__":
    key = jax.random.PRNGKey(0)
    pkey, xkey = jax.random.split(key)
    params = make_params(pkey)
    x = jax.random.normal(xkey, (2, 3, 64, 64), jnp.float32)          # NCHW, like PyTorch
    out = xception_forward(x, params)
    out = jax.block_until_ready(out)
    assert out.shape == (2, 1, 8, 8), out.shape
    assert bool(jnp.all(jnp.isfinite(out)))
    print("KERNEL_OK")
</pallas_src>

<mosaic_0001>
module attributes {stable_mosaic.version = 11 : i64} {
  func.func @_pw_kernel(%arg0: i32, %arg1: memref<512x27xf32, #tpu.memory_space<vmem>>, %arg2: memref<27x8xbf16, #tpu.memory_space<vmem>>, %arg3: memref<1x8xf32, #tpu.memory_space<vmem>>, %arg4: memref<1x8xf32, #tpu.memory_space<vmem>>, %arg5: memref<512x8xf32, #tpu.memory_space<vmem>>) attributes {dimension_semantics = [#tpu.dimension_semantics<parallel>], iteration_bounds = array<i64: 4>, scalar_prefetch = 0 : i64, scratch_operands = 0 : i64, tpu.core_type = #tpu.core_type<tc>, window_params = [{transform_indices = @transform_0, window_bounds = array<i64: 512, 27>}, {pipeline_mode = #tpu.pipeline_mode<synchronous>, transform_indices = @transform_1, window_bounds = array<i64: 27, 8>}, {pipeline_mode = #tpu.pipeline_mode<synchronous>, transform_indices = @transform_2, window_bounds = array<i64: 1, 8>}, {pipeline_mode = #tpu.pipeline_mode<synchronous>, transform_indices = @transform_3, window_bounds = array<i64: 1, 8>}, {transform_indices = @transform_4, window_bounds = array<i64: 512, 8>}]} {
    %c0 = arith.constant 0 : index
    %c0_0 = arith.constant 0 : index
    %0 = vector.load %arg1[%c0, %c0_0] : memref<512x27xf32, #tpu.memory_space<vmem>>, vector<512x27xf32>
    %1 = arith.truncf %0 : vector<512x27xf32> to vector<512x27xbf16>
    %c0_1 = arith.constant 0 : index
    %c0_2 = arith.constant 0 : index
    %2 = vector.load %arg2[%c0_1, %c0_2] : memref<27x8xbf16, #tpu.memory_space<vmem>>, vector<27x8xbf16>
    %cst = arith.constant dense<0.000000e+00> : vector<512x8xf32>
    %3 = tpu.matmul %1, %2, %cst {dimension_numbers = #tpu.dot_dimension_numbers<[1], [0], [0], [1], [0, 0, 1, 1], [], []>} : vector<512x27xbf16>, vector<27x8xbf16>, vector<512x8xf32> -> vector<512x8xf32>
    %c0_3 = arith.constant 0 : index
    %c0_4 = arith.constant 0 : index
    %4 = vector.load %arg3[%c0_3, %c0_4] : memref<1x8xf32, #tpu.memory_space<vmem>>, vector<1x8xf32>
    %5 = vector.broadcast %4 : vector<1x8xf32> to vector<512x8xf32>
    %6 = arith.mulf %3, %5 : vector<512x8xf32>
    %c0_5 = arith.constant 0 : index
    %c0_6 = arith.constant 0 : index
    %7 = vector.load %arg4[%c0_5, %c0_6] : memref<1x8xf32, #tpu.memory_space<vmem>>, vector<1x8xf32>
    %8 = vector.broadcast %7 : vector<1x8xf32> to vector<512x8xf32>
    %9 = arith.addf %6, %8 : vector<512x8xf32>
    %cst_7 = arith.constant 0.000000e+00 : f32
    %10 = vector.broadcast %cst_7 : f32 to vector<512x8xf32>
    %11 = arith.maximumf %9, %10 : vector<512x8xf32>
    %c0_8 = arith.constant 0 : index
    %c0_9 = arith.constant 0 : index
    %12 = vector.load %arg5[%c0_8, %c0_9] : memref<512x8xf32, #tpu.memory_space<vmem>>, vector<512x8xf32>
    tpu.vector_store %arg5[%c0_8, %c0_9], %11 {strides = array<i32>} : memref<512x8xf32, #tpu.memory_space<vmem>>, vector<512x8xf32>,
    return
  }
  func.func @transform_0(%arg0: i32) -> (i32, i32) {
    %c0_i32 = arith.constant 0 : i32
    %c0_i32_0 = arith.constant 0 : i32
    return %arg0, %c0_i32 : i32, i32
  }
  func.func @transform_1(%arg0: i32) -> (i32, i32) {
    %c0_i32 = arith.constant 0 : i32
    %c0_i32_0 = arith.constant 0 : i32
    %c0_i32_1 = arith.constant 0 : i32
    return %c0_i32, %c0_i32_0 : i32, i32
  }
  func.func @transform_2(%arg0: i32) -> (i32, i32) {
    %c0_i32 = arith.constant 0 : i32
    %c0_i32_0 = arith.constant 0 : i32
    %c0_i32_1 = arith.constant 0 : i32
    return %c0_i32, %c0_i32_0 : i32, i32
  }
  func.func @transform_3(%arg0: i32) -> (i32, i32) {
    %c0_i32 = arith.constant 0 : i32
    %c0_i32_0 = arith.constant 0 : i32
    %c0_i32_1 = arith.constant 0 : i32
    return %c0_i32, %c0_i32_0 : i32, i32
  }
  func.func @transform_4(%arg0: i32) -> (i32, i32) {
    %c0_i32 = arith.constant 0 : i32
    %c0_i32_0 = arith.constant 0 : i32
    return %arg0, %c0_i32 : i32, i32
  }
}

</mosaic_0001>

<bundles_post_ra>
// kernel: pointwise.1
= control target key start
LH: loop header
LB: loop body
LE: loop exit
PB: predicated region body
PF: predicated region fallthrough
CT: control target
= control target key end

     0   :  { %s1231_s15 = smov 0   ;;  %s1627_s0 = inlined_call_operand.vmem [shape: f32[2048,27], index: 0, kind: input, shape index: {}]   ;;  %s1628_s1 = inlined_call_operand.vmem [shape: bf16[27,8], index: 1, kind: input, shape index: {}]   ;;  %s1629_s2 = inlined_call_operand.vmem [shape: f32[1,8], index: 2, kind: input, shape index: {}]   ;;  %s1630_s3 = inlined_call_operand.vmem [shape: f32[1,8], index: 3, kind: input, shape index: {}]   ;;  %s1631_s4 = inlined_call_operand.vmem [shape: f32[2048,8], index: 4, kind: output, shape index: {}]  }
   0x1 LB: > { %s1033_s16 = sadd.s32 4294967295, %s1203_s15   ;;  %p1037_p0 = scmp.ge.s32.totalorder %s1203_s15, 1  ;;  %s1203_s15 = sphi %s1231_s15, %s14_s15  }
   0x2   : > { %p163_p1 = scmp.lt.s32.totalorder %s1203_s15, 5 }
   0x4   : > { %p164_p2 = pnand %p1037_p0, %p163_p1 }
   0x5   : > { %v1195_v0 = vld [vmem:[%s1628_s1] sm:$0xff] (!%p164_p2)   ;;  %vm410_vm0 = vcmask (!%p164_p2), 1044480   ;;  %v1196_v1 = vld [vmem:[%s1628_s1 + $0x8] sm:$0x3f] (!%p164_p2)   ;;  %vm411_vm1 = vcmask (!%p164_p2), 1045504   ;;  %s1038_s21 = sshll.u32 (!%p164_p2), %s1033_s16, 6 }
   0x6   : > { %167 = sbr.rel (%p164_p2) target bundleno = 299 (0x12b), region = 36  ;;  %1114 = vmatprep.subr.bf16.mxu0 (!%p164_p2), %v1195_v0  ;;  %1182 = vmatprep.subr.bf16.mxu1 (!%p164_p2), %v1195_v0  ;;  %v1205_v2 = vmov (!%p164_p2), 65535   ;;  %p190_p3 = scmp.lt.s32.totalorder (!%p164_p2), %s1038_s21, 255  ;;  %vm313_vm2 = vcmask (!%p164_p2), 220160   ;;  %vm912_vm3 = vcmask (!%p164_p2), 64512  }
   0x7   : > { %1115 = vmatpush3.bf16.msra.mxu0 (!%p164_p2), %v1195_v0  ;;  %1184 = vmatpush3.bf16.msra.mxu1 (!%p164_p2), %v1195_v0  ;;  %v412_v3 = vsel (!%p164_p2), %vm410_vm0, 4294967295, %v1205_v2 }
   0x8   : > { %v413_v4 = vsel (!%p164_p2), %vm411_vm1, %v412_v3, 0 }
   0x9   : > { %v415_v5 = vand.u32 (!%p164_p2), %v1196_v1, %v413_v4 }
   0xb   : > { %1116 = vmatprep.subr.bf16.mxu0 (!%p164_p2), %v415_v5  ;;  %1183 = vmatprep.subr.bf16.mxu1 (!%p164_p2), %v415_v5 }
   0xc   : > { %1117 = vmatpush3.bf16.msra.mxu0 (!%p164_p2), %v415_v5  ;;  %1185 = vmatpush3.bf16.msra.mxu1 (!%p164_p2), %v415_v5 }
   0xd   : > { %s1633_s21 = smov (!%p190_p3, %s1038_s21), 255 }
   0xe   : > { %s1039_s22 = sshll.u32 %s1633_s21, 3 }
   0xf   : > { %s1253_s25 = scalar_lea.vmem %s1627_s0, %s1039_s22  ;;  %s1372_s6 = scalar_lea.vmem %s1631_s4, %s1039_s22 }
  0x10   : > { %v202_v6 = vld [vmem:[%s1253_s25] sm:$0xff]  ;;  %v203_v7 = vld [vmem:[%s1253_s25 + $0x8] sm:$0xff]  ;;  %v204_v11 = vld [vmem:[%s1253_s25 + $0x10] sm:$0xff] }
  0x11   : > { %v234_v8 = vld [vmem:[%s1253_s25 + $0x100] sm:$0xff]  ;;  %v266_v9 = vpack.c.bf16 %v203_v7, %v202_v6  ;;  %v235_v10 = vld [vmem:[%s1253_s25 + $0x108] sm:$0xff]  ;;  %v205_v12 = vld [vmem:[%s1253_s25 + $0x18] sm:$0xff] }
  0x12   : > { %v282_v13 = vpack.c.bf16 %v235_v10, %v234_v8  ;;  %v267_v14 = vpack.c.bf16 %v205_v12, %v204_v11  ;;  %v236_v15 = vld [vmem:[%s1253_s25 + $0x110] sm:$0xff]  ;;  %v237_v16 = vld [vmem:[%s1253_s25 + $0x118] sm:$0xff]  ;;  %v206_v17 = vld [vmem:[%s1253_s25 + $0x20] sm:$0xff] }
  0x13   : > { %1118 = vmatprep.mubr.msk.bf16.mxu0 %vm313_vm2, %v266_v9  ;;  %v283_v18 = vpack.c.bf16 %v237_v16, %v236_v15  ;;  %v207_v19 = vld [vmem:[%s1253_s25 + $0x28] sm:$0xff]  ;;  %v238_v20 = vld [vmem:[%s1253_s25 + $0x120] sm:$0xff]  ;;  %v208_v24 = vld [vmem:[%s1253_s25 + $0x30] sm:$0xff] }
  0x14   : > { %v239_v21 = vld [vmem:[%s1253_s25 + $0x128] sm:$0xff]  ;;  %1150 = vmatprep.mubr.msk.bf16.mxu1 %vm313_vm2, %v282_v13  ;;  %1119 = vmatmul.mubr.msk.bf16.vlgmr.msra.gmra.mrb[0].mxu0 %vm313_vm2, %v267_v14  ;;  %v268_v22 = vpack.c.bf16 %v207_v19, %v206_v17  ;;  %v209_v25 = vld [vmem:[%s1253_s25 + $0x38] sm:$0xff]  ;;  %v240_v26 = vld [vmem:[%s1253_s25 + $0x130] sm:$0xff] }
  0x15   : > { %v284_v23 = vpack.c.bf16 %v239_v21, %v238_v20  ;;  %1151 = vmatmul.mubr.msk.bf16.vlgmr.msra.gmra.mrb[0].mxu1 %vm313_vm2, %v283_v18  ;;  %v241_v27 = vld [vmem:[%s1253_s25 + $0x138] sm:$0xff]  ;;  %v210_v28 = vld [vmem:[%s1253_s25 + $0x40] sm:$0xff]  ;;  %v211_v29 = vld [vmem:[%s1253_s25 + $0x48] sm:$0xff]  ;;  %v269_v32 = vpack.c.bf16 %v209_v25, %v208_v24 }
  0x16   : > { %1122 = vmatprep.mubr.msk.bf16.mxu0 %vm313_vm2, %v268_v22  ;;  %v242_v30 = vld [vmem:[%s1253_s25 + $0x140] sm:$0xff]  ;;  %v243_v31 = vld [vmem:[%s1253_s25 + $0x148] sm:$0xff]  ;;  %v285_v33 = vpack.c.bf16 %v241_v27, %v240_v26  ;;  %v270_v34 = vpack.c.bf16 %v211_v29, %v210_v28  ;;  %v212_v36 = vld [vmem:[%s1253_s25 + $0x50] sm:$0xff] }
  0x17   : > { %1154 = vmatprep.mubr.msk.bf16.mxu1 %vm313_vm2, %v284_v23  ;;  %v286_v35 = vpack.c.bf16 %v243_v31, %v242_v30  ;;  %v213_v37 = vld [vmem:[%s1253_s25 + $0x58] sm:$0xff]  ;;  %v244_v38 = vld [vmem:[%s1253_s25 + $0x150] sm:$0xff]  ;;  %v214_v40 = vld [vmem:[%s1253_s25 + $0x60] sm:$0xff] }
  0x18   : > { %v245_v39 = vld [vmem:[%s1253_s25 + $0x158] sm:$0xff]  ;;  %v215_v41 = vld [vmem:[%s1253_s25 + $0x68] sm:$0xff]  ;;  %v246_v42 = vld [vmem:[%s1253_s25 + $0x160] sm:$0xff]  ;;  %v271_v44 = vpack.c.bf16 %v213_v37, %v212_v36 }
  0x19   : > { %v247_v43 = vld [vmem:[%s1253_s25 + $0x168] sm:$0xff]  ;;  %v287_v45 = vpack.c.bf16 %v245_v39, %v244_v38  ;;  %v272_v46 = vpack.c.bf16 %v215_v41, %v214_v40  ;;  %v216_v48 = vld [vmem:[%s1253_s25 + $0x70] sm:$0xff]  ;;  %v217_v49 = vld [vmem:[%s1253_s25 + $0x78] sm:$0xff] }
  0x1a   : > { %v288_v47 = vpack.c.bf16 %v247_v43, %v246_v42  ;;  %v248_v50 = vld [vmem:[%s1253_s25 + $0x170] sm:$0xff]  ;;  %v249_v51 = vld [vmem:[%s1253_s25 + $0x178] sm:$0xff]  ;;  %v218_v52 = vld [vmem:[%s1253_s25 + $0x80] sm:$0xff]  ;;  %v273_v56 = vpack.c.bf16 %v217_v49, %v216_v48 }
  0x1b   : > { %v219_v53 = vld [vmem:[%s1253_s25 + $0x88] sm:$0xff]  ;;  %v250_v54 = vld [vmem:[%s1253_s25 + $0x180] sm:$0xff]  ;;  %v289_v57 = vpack.c.bf16 %v249_v51, %v248_v50  ;;  %v220_v60 = vld [vmem:[%s1253_s25 + $0x90] sm:$0xff] }
  0x1c   : > { %1123 = vmatmul.mubr.msk.bf16.gmra.mrb[4].mxu0 %vm313_vm2, %v269_v32  ;;  %v251_v55 = vld [vmem:[%s1253_s25 + $0x188] sm:$0xff]  ;;  %v274_v58 = vpack.c.bf16 %v219_v53, %v218_v52  ;;  %v221_v61 = vld [vmem:[%s1253_s25 + $0x98] sm:$0xff]  ;;  %v252_v62 = vld [vmem:[%s1253_s25 + $0x190] sm:$0xff] }
  0x1d   : > { %1155 = vmatmul.mubr.msk.bf16.gmra.mrb[4].mxu1 %vm313_vm2, %v285_v33  ;;  %1126 = vmatprep.mubr.msk.bf16.mxu0 %vm313_vm2, %v270_v34  ;;  %v290_v59 = vpack.c.bf16 %v251_v55, %v250_v54  ;;  %v253_v63 = vld [vmem:[%s1253_s25 + $0x198] sm:$0xff]  ;;  %v222_v0 = vld [vmem:[%s1253_s25 + $0xa0] sm:$0xff]  ;;  %v223_v1 = vld [vmem:[%s1253_s25 + $0xa8] sm:$0xff]  ;;  %v275_v4 = vpack.c.bf16 %v221_v61, %v220_v60 }
  0x1e   : > { %1158 = vmatprep.mubr.msk.bf16.mxu1 %vm313_vm2, %v286_v35  ;;  %v254_v2 = vld [vmem:[%s1253_s25 + $0x1a0] sm:$0xff]  ;;  %v255_v3 = vld [vmem:[%s1253_s25 + $0x1a8] sm:$0xff]  ;;  %v291_v5 = vpack.c.bf16 %v253_v63, %v252_v62  ;;  %v276_v6 = vpack.c.bf16 %v223_v1, %v222_v0  ;;  %v224_v8 = vld [vmem:[%s1253_s25 + $0xb0] sm:$0xff] }
  0x1f   : > { %v292_v7 = vpack.c.bf16 %v255_v3, %v254_v2  ;;  %v225_v9 = vld [vmem:[%s1253_s25 + $0xb8] sm:$0xff]  ;;  %v256_v10 = vld [vmem:[%s1253_s25 + $0x1b0] sm:$0xff]  ;;  %v226_v12 = vld [vmem:[%s1253_s25 + $0xc0] sm:$0xff] }
  0x20   : > { %v257_v11 = vld [vmem:[%s1253_s25 + $0x1b8] sm:$0xff]  ;;  %v227_v13 = vld [vmem:[%s1253_s25 + $0xc8] sm:$0xff]  ;;  %v258_v14 = vld [vmem:[%s1253_s25 + $0x1c0] sm:$0xff]  ;;  %v277_v16 = vpack.c.bf16 %v225_v9, %v224_v8 }
  0x21   : > { %v259_v15 = vld [vmem:[%s1253_s25 + $0x1c8] sm:$0xff]  ;;  %v293_v17 = vpack.c.bf16 %v257_v11, %v256_v10  ;;  %v278_v18 = vpack.c.bf16 %v227_v13, %v226_v12  ;;  %v228_v20 = vld [vmem:[%s1253_s25 + $0xd0] sm:$0xff]  ;;  %v229_v21 = vld [vmem:[%s1253_s25 + $0xd8] sm:$0xff] }
  0x22   : > { %v294_v19 = vpack.c.bf16 %v259_v15, %v258_v14  ;;  %v260_v22 = vld [vmem:[%s1253_s25 + $0x1d0] sm:$0xff]  ;;  %v261_v23 = vld [vmem:[%s1253_s25 + $0x1d8] sm:$0xff]  ;;  %v230_v24 = vld [vmem:[%s1253_s25 + $0xe0] sm:$0xff]  ;;  %v279_v28 = vpack.c.bf16 %v229_v21, %v228_v20 }
  0x23   : > { %v231_v25 = vld [vmem:[%s1253_s25 + $0xe8] sm:$0xff]  ;;  %v262_v26 = vld [vmem:[%s1253_s25 + $0x1e0] sm:$0xff]  ;;  %v295_v29 = vpack.c.bf16 %v261_v23, %v260_v22  ;;  %v232_v32 = vld [vmem:[%s1253_s25 + $0xf0] sm:$0xff] }
  0x24   : > { %1127 = vmatmul.mubr.msk.bf16.gmra.mrb[8].mxu0 %vm313_vm2, %v271_v44  ;;  %v263_v27 = vld [vmem:[%s1253_s25 + $0x1e8] sm:$0xff]  ;;  %v280_v30 = vpack.c.bf16 %v231_v25, %v230_v24  ;;  %v233_v33 = vld [vmem:[%s1253_s25 + $0xf8] sm:$0xff]  ;;  %v264_v34 = vld [vmem:[%s1253_s25 + $0x1f0] sm:$0xff] }
  0x25   : > { %1159 = vmatmul.mubr.msk.bf16.gmra.mrb[8].mxu1 %vm313_vm2, %v287_v45  ;;  %1130 = vmatprep.mubr.msk.bf16.mxu0 %vm313_vm2, %v272_v46  ;;  %v296_v31 = vpack.c.bf16 %v263_v27, %v262_v26  ;;  %v265_v35 = vld [vmem:[%s1253_s25 + $0x1f8] sm:$0xff]  ;;  %v281_v36 = vpack.c.bf16 %v233_v33, %v232_v32  ;;  %v1354_v38 = vld [vmem:[%s1629_s2] ss:$0 sm:$0xff] }
  0x26   : > { %1162 = vmatprep.mubr.msk.bf16.mxu1 %vm313_vm2, %v288_v47  ;;  %v297_v37 = vpack.c.bf16 %v265_v35, %v264_v34  ;;  %v1359_v40 = vld [vmem:[%s1630_s3] ss:$0 sm:$0xff] }
  0x2c   : > { %1131 = vmatmul.mubr.msk.bf16.gmra.mrb[12].mxu0 %vm313_vm2, %v273_v56 }
  0x2d   : > { %1163 = vmatmul.mubr.msk.bf16.gmra.mrb[12].mxu1 %vm313_vm2, %v289_v57  ;;  %1134 = vmatprep.mubr.msk.bf16.mxu0 %vm313_vm2, %v274_v58 }
  0x2e   : > { %1166 = vmatprep.mubr.msk.bf16.mxu1 %vm313_vm2, %v290_v59 }
  0x34   : > { %1135 = vmatmul.mubr.msk.bf16.gmra.mrb[16].mxu0 %vm313_vm2, %v275_v4 }
  0x35   : > { %1167 = vmatmul.mubr.msk.bf16.gmra.mrb[16].mxu1 %vm313_vm2, %v291_v5  ;;  %1138 = vmatprep.mubr.msk.bf16.mxu0 %vm313_vm2, %v276_v6 }
  0x36   : > { %1170 = vmatprep.mubr.msk.bf16.mxu1 %vm313_vm2, %v292_v7 }
  0x3c   : > { %1139 = vmatmul.mubr.msk.bf16.gmra.mrb[20].mxu0 %vm313_vm2, %v277_v16 }
  0x3d   : > { %1171 = vmatmul.mubr.msk.bf16.gmra.mrb[20].mxu1 %vm313_vm2, %v293_v17  ;;  %1142 = vmatprep.mubr.msk.bf16.mxu0 %vm313_vm2, %v278_v18 }
  0x3e   : > { %1174 = vmatprep.mubr.msk.bf16.mxu1 %vm313_vm2, %v294_v19 }
  0x44   : > { %1143 = vmatmul.mubr.msk.bf16.gmra.mrb[24].mxu0 %vm313_vm2, %v279_v28 }
  0x45   : > { %1175 = vmatmul.mubr.msk.bf16.gmra.mrb[24].mxu1 %vm313_vm2, %v295_v29  ;;  %1146 = vmatprep.mubr.msk.bf16.mxu0 %vm313_vm2, %v280_v30 }
  0x46   : > { %1178 = vmatprep.mubr.msk.bf16.mxu1 %vm313_vm2, %v296_v31 }
  0x4c   : > { %1147 = vmatmul.mubr.msk.bf16.gmra.mrb[28].mxu0 %vm313_vm2, %v281_v36 }
  0x4d   : > { %1179 = vmatmul.mubr.msk.bf16.gmra.mrb[28].mxu1 %vm313_vm2, %v297_v37 }
  0xe7   : > { %v1120_v39 = vpop.f32.mrb[0].mxu0 }
  0xe8   : > { %v715_v41 = vmul.f32 %v1120_v39, %v1354_v38  ;;  %v1152_v42 = vpop.f32.mrb[0].mxu1  ;;  %v451_v43 = vpop.f32.mrb[1].mxu0 }
  0xe9   : > { %v747_v44 = vmul.f32 %v1152_v42, %v1354_v38  ;;  %v713_v45 = vmul.f32 %v1354_v38, %v451_v43  ;;  %v579_v46 = vpop.f32.mrb[1].mxu1  ;;  %v1121_v47 = vpop.f32.mrb[2].mxu0 }
  0xea   : > { %v786_v48 = vadd.f32 %v1359_v40, %v715_v41  ;;  %v745_v49 = vmul.f32 %v1354_v38, %v579_v46  ;;  %v716_v50 = vmul.f32 %v1121_v47, %v1354_v38  ;;  %v1153_v51 = vpop.f32.mrb[2].mxu1  ;;  %v454_v52 = vpop.f32.mrb[3].mxu0 }
  0xeb   : > { %v818_v53 = vadd.f32 %v1359_v40, %v747_v44  ;;  %v784_v54 = vadd.f32 %v1359_v40, %v713_v45  ;;  %v748_v55 = vmul.f32 %v1153_v51, %v1354_v38  ;;  %v714_v56 = vmul.f32 %v1354_v38, %v454_v52  ;;  %v582_v57 = vpop.f32.mrb[3].mxu1 }
  0xec   : > { %v850_v58 = vmax.f32 %v786_v48, 0.0  ;;  %v816_v59 = vadd.f32 %v1359_v40, %v745_v49  ;;  %v787_v60 = vadd.f32 %v1359_v40, %v716_v50  ;;  %v746_v61 = vmul.f32 %v1354_v38, %v582_v57 }
  0xed   : > { %v882_v62 = vmax.f32 %v818_v53, 0.0  ;;  %v848_v63 = vmax.f32 %v784_v54, 0.0  ;;  %v819_v0 = vadd.f32 %v1359_v40, %v748_v55  ;;  %v785_v1 = vadd.f32 %v1359_v40, %v714_v56 }
  0xee   : > { %915 = vst.msk [vmem:[%s1372_s6 + $0x10] sm:$0xff] %vm912_vm3, %v850_v58  ;;  %v880_v2 = vmax.f32 %v816_v59, 0.0  ;;  %v851_v3 = vmax.f32 %v787_v60, 0.0  ;;  %v817_v4 = vadd.f32 %v1359_v40, %v746_v61 }
  0xef   : > { %947 = vst.msk [vmem:[%s1372_s6 + $0x110] sm:$0xff] %vm912_vm3, %v882_v62  ;;  %913 = vst.msk [vmem:[%s1372_s6] sm:$0xff] %vm912_vm3, %v848_v63  ;;  %v883_v5 = vmax.f32 %v819_v0, 0.0  ;;  %v849_v6 = vmax.f32 %v785_v1, 0.0  ;;  %v1124_v7 = vpop.f32.mrb[4].mxu0 }
  0xf0   : > { %945 = vst.msk [vmem:[%s1372_s6 + $0x100] sm:$0xff] %vm912_vm3, %v880_v2  ;;  %916 = vst.msk [vmem:[%s1372_s6 + $0x18] sm:$0xff] %vm912_vm3, %v851_v3  ;;  %v881_v8 = vmax.f32 %v817_v4, 0.0  ;;  %v719_v9 = vmul.f32 %v1124_v7, %v1354_v38  ;;  %v1156_v10 = vpop.f32.mrb[4].mxu1  ;;  %v467_v11 = vpop.f32.mrb[5].mxu0 }
  0xf1   : > { %948 = vst.msk [vmem:[%s1372_s6 + $0x118] sm:$0xff] %vm912_vm3, %v883_v5  ;;  %914 = vst.msk [vmem:[%s1372_s6 + $0x8] sm:$0xff] %vm912_vm3, %v849_v6  ;;  %v751_v12 = vmul.f32 %v1156_v10, %v1354_v38  ;;  %v717_v13 = vmul.f32 %v1354_v38, %v467_v11  ;;  %v595_v14 = vpop.f32.mrb[5].mxu1  ;;  %v1125_v15 = vpop.f32.mrb[6].mxu0 }
  0xf2   : > { %946 = vst.msk [vmem:[%s1372_s6 + $0x108] sm:$0xff] %vm912_vm3, %v881_v8  ;;  %v790_v16 = vadd.f32 %v1359_v40, %v719_v9  ;;  %v749_v17 = vmul.f32 %v1354_v38, %v595_v14  ;;  %v720_v18 = vmul.f32 %v1125_v15, %v1354_v38  ;;  %v1157_v19 = vpop.f32.mrb[6].mxu1  ;;  %v470_v20 = vpop.f32.mrb[7].mxu0 }
  0xf3   : > { %v822_v21 = vadd.f32 %v1359_v40, %v751_v12  ;;  %v788_v22 = vadd.f32 %v1359_v40, %v717_v13  ;;  %v752_v23 = vmul.f32 %v1157_v19, %v1354_v38  ;;  %v718_v24 = vmul.f32 %v1354_v38, %v470_v20  ;;  %v598_v25 = vpop.f32.mrb[7].mxu1 }
  0xf4   : > { %v854_v26 = vmax.f32 %v790_v16, 0.0  ;;  %v820_v27 = vadd.f32 %v1359_v40, %v749_v17  ;;  %v791_v28 = vadd.f32 %v1359_v40, %v720_v18  ;;  %v750_v29 = vmul.f32 %v1354_v38, %v598_v25 }
  0xf5   : > { %v886_v30 = vmax.f32 %v822_v21, 0.0  ;;  %v852_v31 = vmax.f32 %v788_v22, 0.0  ;;  %v823_v32 = vadd.f32 %v1359_v40, %v752_v23  ;;  %v789_v33 = vadd.f32 %v1359_v40, %v718_v24 }
  0xf6   : > { %919 = vst.msk [vmem:[%s1372_s6 + $0x30] sm:$0xff] %vm912_vm3, %v854_v26  ;;  %v884_v34 = vmax.f32 %v820_v27, 0.0  ;;  %v855_v35 = vmax.f32 %v791_v28, 0.0  ;;  %v821_v36 = vadd.f32 %v1359_v40, %v750_v29 }
  0xf7   : > { %951 = vst.msk [vmem:[%s1372_s6 + $0x130] sm:$0xff] %vm912_vm3, %v886_v30  ;;  %917 = vst.msk [vmem:[%s1372_s6 + $0x20] sm:$0xff] %vm912_vm3, %v852_v31  ;;  %v887_v37 = vmax.f32 %v823_v32, 0.0  ;;  %v853_v39 = vmax.f32 %v789_v33, 0.0  ;;  %v1128_v41 = vpop.f32.mrb[8].mxu0 }
  0xf8   : > { %949 = vst.msk [vmem:[%s1372_s6 + $0x120] sm:$0xff] %vm912_vm3, %v884_v34  ;;  %920 = vst.msk [vmem:[%s1372_s6 + $0x38] sm:$0xff] %vm912_vm3, %v855_v35  ;;  %v885_v42 = vmax.f32 %v821_v36, 0.0  ;;  %v723_v43 = vmul.f32 %v1128_v41, %v1354_v38  ;;  %v1160_v44 = vpop.f32.mrb[8].mxu1  ;;  %v483_v45 = vpop.f32.mrb[9].mxu0 }
  0xf9   : > { %952 = vst.msk [vmem:[%s1372_s6 + $0x138] sm:$0xff] %vm912_vm3, %v887_v37  ;;  %918 = vst.msk [vmem:[%s1372_s6 + $0x28] sm:$0xff] %vm912_vm3, %v853_v39  ;;  %v755_v46 = vmul.f32 %v1160_v44, %v1354_v38  ;;  %v721_v47 = vmul.f32 %v1354_v38, %v483_v45  ;;  %v611_v48 = vpop.f32.mrb[9].mxu1  ;;  %v1129_v49 = vpop.f32.mrb[10].mxu0 }
  0xfa   : > { %950 = vst.msk [vmem:[%s1372_s6 + $0x128] sm:$0xff] %vm912_vm3, %v885_v42  ;;  %v794_v50 = vadd.f32 %v1359_v40, %v723_v43  ;;  %v753_v51 = vmul.f32 %v1354_v38, %v611_v48  ;;  %v724_v52 = vmul.f32 %v1129_v49, %v1354_v38  ;;  %v1161_v53 = vpop.f32.mrb[10].mxu1  ;;  %v486_v54 = vpop.f32.mrb[11].mxu0 }
  0xfb   : > { %v826_v55 = vadd.f32 %v1359_v40, %v755_v46  ;;  %v792_v56 = vadd.f32 %v1359_v40, %v721_v47  ;;  %v756_v57 = vmul.f32 %v1161_v53, %v1354_v38  ;;  %v722_v58 = vmul.f32 %v1354_v38, %v486_v54  ;;  %v614_v59 = vpop.f32.mrb[11].mxu1 }
  0xfc   : > { %v858_v60 = vmax.f32 %v794_v50, 0.0  ;;  %v824_v61 = vadd.f32 %v1359_v40, %v753_v51  ;;  %v795_v62 = vadd.f32 %v1359_v40, %v724_v52  ;;  %v754_v63 = vmul.f32 %v1354_v38, %v614_v59 }
  0xfd   : > { %v890_v0 = vmax.f32 %v826_v55, 0.0  ;;  %v856_v1 = vmax.f32 %v792_v56, 0.0  ;;  %v827_v2 = vadd.f32 %v1359_v40, %v756_v57  ;;  %v793_v3 = vadd.f32 %v1359_v40, %v722_v58 }
  0xfe   : > { %923 = vst.msk [vmem:[%s1372_s6 + $0x50] sm:$0xff] %vm912_vm3, %v858_v60  ;;  %v888_v4 = vmax.f32 %v824_v61, 0.0  ;;  %v859_v5 = vmax.f32 %v795_v62, 0.0  ;;  %v825_v6 = vadd.f32 %v1359_v40, %v754_v63 }
  0xff   : > { %955 = vst.msk [vmem:[%s1372_s6 + $0x150] sm:$0xff] %vm912_vm3, %v890_v0  ;;  %921 = vst.msk [vmem:[%s1372_s6 + $0x40] sm:$0xff] %vm912_vm3, %v856_v1  ;;  %v891_v7 = vmax.f32 %v827_v2, 0.0  ;;  %v857_v8 = vmax.f32 %v793_v3, 0.0  ;;  %v1132_v9 = vpop.f32.mrb[12].mxu0 }
 0x100   : > { %953 = vst.msk [vmem:[%s1372_s6 + $0x140] sm:$0xff] %vm912_vm3, %v888_v4  ;;  %924 = vst.msk [vmem:[%s1372_s6 + $0x58] sm:$0xff] %vm912_vm3, %v859_v5  ;;  %v889_v10 = vmax.f32 %v825_v6, 0.0  ;;  %v727_v11 = vmul.f32 %v1132_v9, %v1354_v38  ;;  %v1164_v12 = vpop.f32.mrb[12].mxu1  ;;  %v499_v13 = vpop.f32.mrb[13].mxu0 }
 0x101   : > { %956 = vst.msk [vmem:[%s1372_s6 + $0x158] sm:$0xff] %vm912_vm3, %v891_v7  ;;  %922 = vst.msk [vmem:[%s1372_s6 + $0x48] sm:$0xff] %vm912_vm3, %v857_v8  ;;  %v759_v14 = vmul.f32 %v1164_v12, %v1354_v38  ;;  %v725_v15 = vmul.f32 %v1354_v38, %v499_v13  ;;  %v627_v16 = vpop.f32.mrb[13].mxu1  ;;  %v1133_v17 = vpop.f32.mrb[14].mxu0 }
 0x102   : > { %954 = vst.msk [vmem:[%s1372_s6 + $0x148] sm:$0xff] %vm912_vm3, %v889_v10  ;;  %v798_v18 = vadd.f32 %v1359_v40, %v727_v11  ;;  %v757_v19 = vmul.f32 %v1354_v38, %v627_v16  ;;  %v728_v20 = vmul.f32 %v1133_v17, %v1354_v38  ;;  %v1165_v21 = vpop.f32.mrb[14].mxu1  ;;  %v502_v22 = vpop.f32.mrb[15].mxu0 }
 0x103   : > { %v830_v23 = vadd.f32 %v1359_v40, %v759_v14  ;;  %v796_v24 = vadd.f32 %v1359_v40, %v725_v15  ;;  %v760_v25 = vmul.f32 %v1165_v21, %v1354_v38  ;;  %v726_v26 = vmul.f32 %v1354_v38, %v502_v22  ;;  %v630_v27 = vpop.f32.mrb[15].mxu1 }
 0x104   : > { %v862_v28 = vmax.f32 %v798_v18, 0.0  ;;  %v828_v29 = vadd.f32 %v1359_v40, %v757_v19  ;;  %v799_v30 = vadd.f32 %v1359_v40, %v728_v20  ;;  %v758_v31 = vmul.f32 %v1354_v38, %v630_v27 }
 0x105   : > { %v894_v32 = vmax.f32 %v830_v23, 0.0  ;;  %v860_v33 = vmax.f32 %v796_v24, 0.0  ;;  %v831_v34 = vadd.f32 %v1359_v40, %v760_v25  ;;  %v797_v35 = vadd.f32 %v1359_v40, %v726_v26 }
 0x106   : > { %927 = vst.msk [vmem:[%s1372_s6 + $0x70] sm:$0xff] %vm912_vm3, %v862_v28  ;;  %v892_v36 = vmax.f32 %v828_v29, 0.0  ;;  %v863_v37 = vmax.f32 %v799_v30, 0.0  ;;  %v829_v39 = vadd.f32 %v1359_v40, %v758_v31 }
 0x107   : > { %959 = vst.msk [vmem:[%s1372_s6 + $0x170] sm:$0xff] %vm912_vm3, %v894_v32  ;;  %925 = vst.msk [vmem:[%s1372_s6 + $0x60] sm:$0xff] %vm912_vm3, %v860_v33  ;;  %v895_v41 = vmax.f32 %v831_v34, 0.0  ;;  %v861_v42 = vmax.f32 %v797_v35, 0.0  ;;  %v1136_v43 = vpop.f32.mrb[16].mxu0 }
 0x108   : > { %957 = vst.msk [vmem:[%s1372_s6 + $0x160] sm:$0xff] %vm912_vm3, %v892_v36  ;;  %928 = vst.msk [vmem:[%s1372_s6 + $0x78] sm:$0xff] %vm912_vm3, %v863_v37  ;;  %v893_v44 = vmax.f32 %v829_v39, 0.0  ;;  %v731_v45 = vmul.f32 %v1136_v43, %v1354_v38  ;;  %v1168_v46 = vpop.f32.mrb[16].mxu1  ;;  %v515_v47 = vpop.f32.mrb[17].mxu0 }
 0x109   : > { %960 = vst.msk [vmem:[%s1372_s6 + $0x178] sm:$0xff] %vm912_vm3, %v895_v41  ;;  %926 = vst.msk [vmem:[%s1372_s6 + $0x68] sm:$0xff] %vm912_vm3, %v861_v42  ;;  %v763_v48 = vmul.f32 %v1168_v46, %v1354_v38  ;;  %v729_v49 = vmul.f32 %v1354_v38, %v515_v47  ;;  %v643_v50 = vpop.f32.mrb[17].mxu1  ;;  %v1137_v51 = vpop.f32.mrb[18].mxu0 }
 0x10a   : > { %958 = vst.msk [vmem:[%s1372_s6 + $0x168] sm:$0xff] %vm912_vm3, %v893_v44  ;;  %v802_v52 = vadd.f32 %v1359_v40, %v731_v45  ;;  %v761_v53 = vmul.f32 %v1354_v38, %v643_v50  ;;  %v732_v54 = vmul.f32 %v1137_v51, %v1354_v38  ;;  %v1169_v55 = vpop.f32.mrb[18].mxu1  ;;  %v518_v56 = vpop.f32.mrb[19].mxu0 }
 0x10b   : > { %v834_v57 = vadd.f32 %v1359_v40, %v763_v48  ;;  %v800_v58 = vadd.f32 %v1359_v40, %v729_v49  ;;  %v764_v59 = vmul.f32 %v1169_v55, %v1354_v38  ;;  %v730_v60 = vmul.f32 %v1354_v38, %v518_v56  ;;  %v646_v61 = vpop.f32.mrb[19].mxu1 }
 0x10c   : > { %v866_v62 = vmax.f32 %v802_v52, 0.0  ;;  %v832_v63 = vadd.f32 %v1359_v40, %v761_v53  ;;  %v803_v0 = vadd.f32 %v1359_v40, %v732_v54  ;;  %v762_v1 = vmul.f32 %v1354_v38, %v646_v61 }
 0x10d   : > { %v898_v2 = vmax.f32 %v834_v57, 0.0  ;;  %v864_v3 = vmax.f32 %v800_v58, 0.0  ;;  %v835_v4 = vadd.f32 %v1359_v40, %v764_v59  ;;  %v801_v5 = vadd.f32 %v1359_v40, %v730_v60 }
 0x10e   : > { %931 = vst.msk [vmem:[%s1372_s6 + $0x90] sm:$0xff] %vm912_vm3, %v866_v62  ;;  %v896_v6 = vmax.f32 %v832_v63, 0.0  ;;  %v867_v7 = vmax.f32 %v803_v0, 0.0  ;;  %v833_v8 = vadd.f32 %v1359_v40, %v762_v1 }
 0x10f   : > { %963 = vst.msk [vmem:[%s1372_s6 + $0x190] sm:$0xff] %vm912_vm3, %v898_v2  ;;  %929 = vst.msk [vmem:[%s1372_s6 + $0x80] sm:$0xff] %vm912_vm3, %v864_v3  ;;  %v899_v9 = vmax.f32 %v835_v4, 0.0  ;;  %v865_v10 = vmax.f32 %v801_v5, 0.0  ;;  %v1140_v11 = vpop.f32.mrb[20].mxu0 }
 0x110   : > { %961 = vst.msk [vmem:[%s1372_s6 + $0x180] sm:$0xff] %vm912_vm3, %v896_v6  ;;  %932 = vst.msk [vmem:[%s1372_s6 + $0x98] sm:$0xff] %vm912_vm3, %v867_v7  ;;  %v897_v12 = vmax.f32 %v833_v8, 0.0  ;;  %v735_v13 = vmul.f32 %v1140_v11, %v1354_v38  ;;  %v1172_v14 = vpop.f32.mrb[20].mxu1  ;;  %v531_v15 = vpop.f32.mrb[21].mxu0 }
 0x111   : > { %964 = vst.msk [vmem:[%s1372_s6 + $0x198] sm:$0xff] %vm912_vm3, %v899_v9  ;;  %930 = vst.msk [vmem:[%s1372_s6 + $0x88] sm:$0xff] %vm912_vm3, %v865_v10  ;;  %v767_v16 = vmul.f32 %v1172_v14, %v1354_v38  ;;  %v733_v17 = vmul.f32 %v1354_v38, %v531_v15  ;;  %v659_v18 = vpop.f32.mrb[21].mxu1  ;;  %v1141_v19 = vpop.f32.mrb[22].mxu0 }
 0x112   : > { %962 = vst.msk [vmem:[%s1372_s6 + $0x188] sm:$0xff] %vm912_vm3, %v897_v12  ;;  %v806_v20 = vadd.f32 %v1359_v40, %v735_v13  ;;  %v765_v21 = vmul.f32 %v1354_v38, %v659_v18  ;;  %v736_v22 = vmul.f32 %v1141_v19, %v1354_v38  ;;  %v1173_v23 = vpop.f32.mrb[22].mxu1  ;;  %v534_v24 = vpop.f32.mrb[23].mxu0 }
 0x113   : > { %v838_v25 = vadd.f32 %v1359_v40, %v767_v16  ;;  %v804_v26 = vadd.f32 %v1359_v40, %v733_v17  ;;  %v768_v27 = vmul.f32 %v1173_v23, %v1354_v38  ;;  %v734_v28 = vmul.f32 %v1354_v38, %v534_v24  ;;  %v662_v29 = vpop.f32.mrb[23].mxu1 }
 0x114   : > { %v870_v30 = vmax.f32 %v806_v20, 0.0  ;;  %v836_v31 = vadd.f32 %v1359_v40, %v765_v21  ;;  %v807_v32 = vadd.f32 %v1359_v40, %v736_v22  ;;  %v766_v33 = vmul.f32 %v1354_v38, %v662_v29 }
 0x115   : > { %v902_v34 = vmax.f32 %v838_v25, 0.0  ;;  %v868_v35 = vmax.f32 %v804_v26, 0.0  ;;  %v839_v36 = vadd.f32 %v1359_v40, %v768_v27  ;;  %v805_v37 = vadd.f32 %v1359_v40, %v734_v28 }
 0x116   : > { %935 = vst.msk [vmem:[%s1372_s6 + $0xb0] sm:$0xff] %vm912_vm3, %v870_v30  ;;  %v900_v39 = vmax.f32 %v836_v31, 0.0  ;;  %v871_v41 = vmax.f32 %v807_v32, 0.0  ;;  %v837_v42 = vadd.f32 %v1359_v40, %v766_v33 }
 0x117   : > { %967 = vst.msk [vmem:[%s1372_s6 + $0x1b0] sm:$0xff] %vm912_vm3, %v902_v34  ;;  %933 = vst.msk [vmem:[%s1372_s6 + $0xa0] sm:$0xff] %vm912_vm3, %v868_v35  ;;  %v903_v43 = vmax.f32 %v839_v36, 0.0  ;;  %v869_v44 = vmax.f32 %v805_v37, 0.0  ;;  %v1144_v45 = vpop.f32.mrb[24].mxu0 }
 0x118   : > { %965 = vst.msk [vmem:[%s1372_s6 + $0x1a0] sm:$0xff] %vm912_vm3, %v900_v39  ;;  %936 = vst.msk [vmem:[%s1372_s6 + $0xb8] sm:$0xff] %vm912_vm3, %v871_v41  ;;  %v901_v46 = vmax.f32 %v837_v42, 0.0  ;;  %v739_v47 = vmul.f32 %v1144_v45, %v1354_v38  ;;  %v1176_v48 = vpop.f32.mrb[24].mxu1  ;;  %v547_v49 = vpop.f32.mrb[25].mxu0 }
 0x119   : > { %968 = vst.msk [vmem:[%s1372_s6 + $0x1b8] sm:$0xff] %vm912_vm3, %v903_v43  ;;  %934 = vst.msk [vmem:[%s1372_s6 + $0xa8] sm:$0xff] %vm912_vm3, %v869_v44  ;;  %v771_v50 = vmul.f32 %v1176_v48, %v1354_v38  ;;  %v737_v51 = vmul.f32 %v1354_v38, %v547_v49  ;;  %v675_v52 = vpop.f32.mrb[25].mxu1  ;;  %v1145_v53 = vpop.f32.mrb[26].mxu0 }
 0x11a   : > { %966 = vst.msk [vmem:[%s1372_s6 + $0x1a8] sm:$0xff] %vm912_vm3, %v901_v46  ;;  %v810_v54 = vadd.f32 %v1359_v40, %v739_v47  ;;  %v769_v55 = vmul.f32 %v1354_v38, %v675_v52  ;;  %v740_v56 = vmul.f32 %v1145_v53, %v1354_v38  ;;  %v1177_v57 = vpop.f32.mrb[26].mxu1  ;;  %v550_v58 = vpop.f32.mrb[27].mxu0 }
 0x11b   : > { %v842_v59 = vadd.f32 %v1359_v40, %v771_v50  ;;  %v808_v60 = vadd.f32 %v1359_v40, %v737_v51  ;;  %v772_v61 = vmul.f32 %v1177_v57, %v1354_v38  ;;  %v738_v62 = vmul.f32 %v1354_v38, %v550_v58  ;;  %v678_v63 = vpop.f32.mrb[27].mxu1 }
 0x11c   : > { %v874_v0 = vmax.f32 %v810_v54, 0.0  ;;  %v840_v1 = vadd.f32 %v1359_v40, %v769_v55  ;;  %v811_v2 = vadd.f32 %v1359_v40, %v740_v56  ;;  %v770_v3 = vmul.f32 %v1354_v38, %v678_v63 }
 0x11d   : > { %v906_v4 = vmax.f32 %v842_v59, 0.0  ;;  %v872_v5 = vmax.f32 %v808_v60, 0.0  ;;  %v843_v6 = vadd.f32 %v1359_v40, %v772_v61  ;;  %v809_v7 = vadd.f32 %v1359_v40, %v738_v62 }
 0x11e   : > { %939 = vst.msk [vmem:[%s1372_s6 + $0xd0] sm:$0xff] %vm912_vm3, %v874_v0  ;;  %v904_v8 = vmax.f32 %v840_v1, 0.0  ;;  %v875_v9 = vmax.f32 %v811_v2, 0.0  ;;  %v841_v10 = vadd.f32 %v1359_v40, %v770_v3 }
 0x11f   : > { %971 = vst.msk [vmem:[%s1372_s6 + $0x1d0] sm:$0xff] %vm912_vm3, %v906_v4  ;;  %937 = vst.msk [vmem:[%s1372_s6 + $0xc0] sm:$0xff] %vm912_vm3, %v872_v5  ;;  %v907_v11 = vmax.f32 %v843_v6, 0.0  ;;  %v873_v12 = vmax.f32 %v809_v7, 0.0  ;;  %v1148_v13 = vpop.f32.mrb[28].mxu0 }
 0x120   : > { %969 = vst.msk [vmem:[%s1372_s6 + $0x1c0] sm:$0xff] %vm912_vm3, %v904_v8  ;;  %940 = vst.msk [vmem:[%s1372_s6 + $0xd8] sm:$0xff] %vm912_vm3, %v875_v9  ;;  %v905_v14 = vmax.f32 %v841_v10, 0.0  ;;  %v743_v15 = vmul.f32 %v1148_v13, %v1354_v38  ;;  %v1180_v16 = vpop.f32.mrb[28].mxu1  ;;  %v563_v17 = vpop.f32.mrb[29].mxu0 }
 0x121   : > { %972 = vst.msk [vmem:[%s1372_s6 + $0x1d8] sm:$0xff] %vm912_vm3, %v907_v11  ;;  %938 = vst.msk [vmem:[%s1372_s6 + $0xc8] sm:$0xff] %vm912_vm3, %v873_v12  ;;  %v775_v18 = vmul.f32 %v1180_v16, %v1354_v38  ;;  %v741_v19 = vmul.f32 %v1354_v38, %v563_v17  ;;  %v691_v20 = vpop.f32.mrb[29].mxu1  ;;  %v1149_v21 = vpop.f32.mrb[30].mxu0 }
 0x122   : > { %970 = vst.msk [vmem:[%s1372_s6 + $0x1c8] sm:$0xff] %vm912_vm3, %v905_v14  ;;  %v814_v22 = vadd.f32 %v1359_v40, %v743_v15  ;;  %v773_v23 = vmul.f32 %v1354_v38, %v691_v20  ;;  %v744_v24 = vmul.f32 %v1149_v21, %v1354_v38  ;;  %v1181_v25 = vpop.f32.mrb[30].mxu1  ;;  %v566_v26 = vpop.f32.mrb[31].mxu0 }
 0x123   : > { %v846_v27 = vadd.f32 %v1359_v40, %v775_v18  ;;  %v812_v28 = vadd.f32 %v1359_v40, %v741_v19  ;;  %v776_v29 = vmul.f32 %v1181_v25, %v1354_v38  ;;  %v742_v30 = vmul.f32 %v1354_v38, %v566_v26  ;;  %v694_v31 = vpop.f32.mrb[31].mxu1 }
 0x124   : > { %v878_v32 = vmax.f32 %v814_v22, 0.0  ;;  %v844_v33 = vadd.f32 %v1359_v40, %v773_v23  ;;  %v815_v34 = vadd.f32 %v1359_v40, %v744_v24  ;;  %v774_v35 = vmul.f32 %v1354_v38, %v694_v31 }
 0x125   : > { %v910_v36 = vmax.f32 %v846_v27, 0.0  ;;  %v876_v37 = vmax.f32 %v812_v28, 0.0  ;;  %v847_v39 = vadd.f32 %v1359_v40, %v776_v29  ;;  %v813_v41 = vadd.f32 %v1359_v40, %v742_v30 }
 0x126   : > { %943 = vst.msk [vmem:[%s1372_s6 + $0xf0] sm:$0xff] %vm912_vm3, %v878_v32  ;;  %v908_v42 = vmax.f32 %v844_v33, 0.0  ;;  %v879_v43 = vmax.f32 %v815_v34, 0.0  ;;  %v845_v44 = vadd.f32 %v1359_v40, %v774_v35 }
 0x127   : > { %975 = vst.msk [vmem:[%s1372_s6 + $0x1f0] sm:$0xff] %vm912_vm3, %v910_v36  ;;  %941 = vst.msk [vmem:[%s1372_s6 + $0xe0] sm:$0xff] %vm912_vm3, %v876_v37  ;;  %v911_v38 = vmax.f32 %v847_v39, 0.0  ;;  %v877_v45 = vmax.f32 %v813_v41, 0.0 }
 0x128   : > { %973 = vst.msk [vmem:[%s1372_s6 + $0x1e0] sm:$0xff] %vm912_vm3, %v908_v42  ;;  %944 = vst.msk [vmem:[%s1372_s6 + $0xf8] sm:$0xff] %vm912_vm3, %v879_v43  ;;  %v909_v46 = vmax.f32 %v845_v44, 0.0 }
 0x129   : > { %976 = vst.msk [vmem:[%s1372_s6 + $0x1f8] sm:$0xff] %vm912_vm3, %v911_v38  ;;  %942 = vst.msk [vmem:[%s1372_s6 + $0xe8] sm:$0xff] %vm912_vm3, %v877_v45 }
 0x12a   : > { %974 = vst.msk [vmem:[%s1372_s6 + $0x1e8] sm:$0xff] %vm912_vm3, %v909_v46 }
 0x12b PF: > { %s14_s15 = sadd.s32 1, %s1203_s15  }
 0x12c   : > { %p11_p4 = scmp.ge.s32.totalorder %s14_s15, 6  }
 0x12e   :  { %13 = sbr.rel (!%p11_p4) target bundleno = 1 (0x1), region = 66 }

</bundles_post_ra>
